<compile_context>
chip_gen: v7x
topology: tpu7x:2x2x1
jax: 0.10.0
libtpu: 0.0.40
codegen_flags: <defaults>
</compile_context>

<pallas_src>
import jax
import jax.numpy as jnp
from jax.experimental import pallas as pl
from jax.experimental.pallas import tpu as pltpu

EPS = 1e-5


def cbn_kernel(x_ref, c_ref, wg_ref, bg_ref, wb_ref, bb_ref, o_ref):
    # x_ref:  (B, f_tile, T)   c_ref: (B, C)
    # wg/wb:  (f_tile, C)      bg/bb: (f_tile, 1)
    cc = c_ref[...].astype(jnp.float32)
    wg = wg_ref[...].astype(jnp.float32)
    wb = wb_ref[...].astype(jnp.float32)

    # Conv1d with kernel size 1 == per-sample linear map on the channel dim.
    # einsum('bc,fc->bf') contracts directly on the MXU (no explicit transpose emitted).
    gamma = jnp.einsum("bc,fc->bf", cc, wg, preferred_element_type=jnp.float32)
    beta = jnp.einsum("bc,fc->bf", cc, wb, preferred_element_type=jnp.float32)
    gamma = gamma[:, :, None] + bg_ref[...].astype(jnp.float32)[None, :, :]  # (B, f_tile, 1)
    beta = beta[:, :, None] + bb_ref[...].astype(jnp.float32)[None, :, :]    # (B, f_tile, 1)

    # BatchNorm1d (training mode, affine=False): per-channel stats over batch and length,
    # biased variance, eps = 1e-5.  Stats accumulate in f32; centered variance is kept for
    # numerical stability (the extra VALU pass is hidden under the HBM stream).
    x = x_ref[...].astype(jnp.float32)                           # (B, f_tile, T)
    mean = jnp.mean(x, axis=(0, 2), keepdims=True)               # (1, f_tile, 1)
    var = jnp.mean((x - mean) ** 2, axis=(0, 2), keepdims=True)  # biased variance
    inv = jax.lax.rsqrt(var + EPS)                                # EUP rsqrt, (1, f_tile, 1)

    # Fold BN + conditional affine into a single per-(b, f) scale/shift:
    #   out = gamma * (x - mean) * inv + beta == x * scale + shift
    scale = gamma * inv                                           # (B, f_tile, 1)
    shift = beta - scale * mean                                    # (B, f_tile, 1)
    o_ref[...] = (x * scale + shift).astype(o_ref.dtype)


def _vmem_capacity_bytes():
    """Physical VMEM per TensorCore; conservative 64 MiB (v7x) fallback."""
    try:
        return int(pltpu.get_tpu_info().vmem_capacity_bytes)
    except Exception:
        return 64 << 20


def _pick_f_tile(B, F, T, itemsize, block_budget_bytes):
    """Largest legal channel tile whose (B, f_tile, T) block fits the VMEM budget.

    Legal tiles divide F and are a multiple of 8 (sublane rule) or equal to F.
    Prefers >= 2 grid steps so a v7x megacore can shard the F axis across both TCs.
    """
    legal = [d for d in range(1, F + 1) if F % d == 0 and (d % 8 == 0 or d == F)]
    fits = [d for d in legal if B * d * T * itemsize <= block_budget_bytes]
    if not fits:
        # See TODO(synk) above: fall back to the smallest legal tile (may exceed budget).
        fits = [min(legal)]
    multi_step = [d for d in fits if F // d >= 2]
    return max(multi_step) if multi_step else max(fits)


def cbatchnorm1d(x, c, w_gamma, b_gamma, w_beta, b_beta, *, f_tile=None):
    """Pallas implementation of CBatchNorm1d.forward (training-mode batch norm)."""
    if c.ndim == 3:  # (B, C, 1) -> (B, C); mirrors the unsqueeze path in PyTorch
        c = c[:, :, 0]
    B, F, T = x.shape
    C = c.shape[1]
    assert c.shape[0] == B

    # VMEM budgeting: per grid step ~4x block bytes are live (x block + out block, each
    # double-buffered by the pipeline).  Raise the scoped-VMEM limit relative to physical
    # VMEM and cap a single block at ~12 MiB so the same sizing is safe on v7x (64 MiB),
    # v6e and v5e (128 MiB).
    vmem_cap = _vmem_capacity_bytes()
    vmem_limit = max(32 << 20, min(100 << 20, vmem_cap * 3 // 4))
    block_budget = min(12 << 20, (vmem_limit * 4 // 5) // 4)
    if f_tile is None:
        f_tile = _pick_f_tile(B, F, T, x.dtype.itemsize, block_budget)
    assert F % f_tile == 0

    bg2 = b_gamma.reshape(F, 1)
    bb2 = b_beta.reshape(F, 1)

    grid = (F // f_tile,)  # channels are independent for both the stats and the affine map
    return pl.pallas_call(
        cbn_kernel,
        out_shape=jax.ShapeDtypeStruct((B, F, T), x.dtype),
        grid_spec=pltpu.PrefetchScalarGridSpec(
            num_scalar_prefetch=0,
            grid=grid,
            in_specs=[
                pl.BlockSpec((B, f_tile, T), lambda i: (0, i, 0)),  # x
                pl.BlockSpec((B, C), lambda i: (0, 0)),             # c (replicated, tiny)
                pl.BlockSpec((f_tile, C), lambda i: (i, 0)),        # W_gamma
                pl.BlockSpec((f_tile, 1), lambda i: (i, 0)),        # b_gamma
                pl.BlockSpec((f_tile, C), lambda i: (i, 0)),        # W_beta
                pl.BlockSpec((f_tile, 1), lambda i: (i, 0)),        # b_beta
            ],
            out_specs=pl.BlockSpec((B, f_tile, T), lambda i: (0, i, 0)),
        ),
        compiler_params=pltpu.CompilerParams(
            dimension_semantics=("parallel",),
            vmem_limit_bytes=int(vmem_limit),
        ),
    )(x, c, w_gamma, bg2, w_beta, bb2)


def reference(x, c, wg, bg, wb, bb):
    """Pure-JAX reference mirroring the PyTorch forward."""
    if c.ndim == 3:
        c = c[:, :, 0]
    gamma = jnp.einsum("bc,fc->bf", c, wg) + bg
    beta = jnp.einsum("bc,fc->bf", c, wb) + bb
    mean = x.mean(axis=(0, 2), keepdims=True)
    var = ((x - mean) ** 2).mean(axis=(0, 2), keepdims=True)
    net = (x - mean) / jnp.sqrt(var + EPS)
    return gamma[:, :, None] * net + beta[:, :, None]


if __name__ == "__main__":
    # T chosen as a multiple of 128 so x/out blocks are lane-dense (unmasked stores);
    # shapes stay small: x is (2, 32, 128), c is (2, 8).
    B, C_DIM, F_DIM, T = 2, 8, 32, 128

    key = jax.random.PRNGKey(0)
    kx, kc, kwg, kwb, kbg, kbb = jax.random.split(key, 6)

    x = jax.random.normal(kx, (B, F_DIM, T), dtype=jnp.float32)
    c = jax.random.normal(kc, (B, C_DIM), dtype=jnp.float32)

    # Parameter shapes follow nn.Conv1d(c_dim, f_dim, 1): weight (f_dim, c_dim[,1]), bias (f_dim,).
    # The module's reset_parameters() would give W=0, b_gamma=1, b_beta=0 (a degenerate identity
    # affine); small deterministic random values are used instead so the matmul path is exercised.
    # Forward semantics do not depend on the parameter values.
    w_gamma = 0.1 * jax.random.normal(kwg, (F_DIM, C_DIM), dtype=jnp.float32)
    w_beta = 0.1 * jax.random.normal(kwb, (F_DIM, C_DIM), dtype=jnp.float32)
    b_gamma = jnp.ones((F_DIM,), dtype=jnp.float32) + 0.01 * jax.random.normal(kbg, (F_DIM,))
    b_beta = 0.01 * jax.random.normal(kbb, (F_DIM,))

    out = cbatchnorm1d(x, c, w_gamma, b_gamma, w_beta, b_beta)
    out = jax.block_until_ready(out)

    ref = reference(x, c, w_gamma, b_gamma, w_beta, b_beta)
    assert out.shape == (B, F_DIM, T)
    assert jnp.allclose(out, ref, atol=1e-4, rtol=1e-4), "mismatch vs pure-JAX reference"

    print("KERNEL_OK")
</pallas_src>

<mosaic_0001>
module attributes {stable_mosaic.version = 11 : i64} {
  func.func @cbn_kernel(%arg0: i32, %arg1: memref<2x16x128xf32, #tpu.memory_space<vmem>>, %arg2: memref<2x8xf32, #tpu.memory_space<vmem>>, %arg3: memref<16x8xf32, #tpu.memory_space<vmem>>, %arg4: memref<16x1xf32, #tpu.memory_space<vmem>>, %arg5: memref<16x8xf32, #tpu.memory_space<vmem>>, %arg6: memref<16x1xf32, #tpu.memory_space<vmem>>, %arg7: memref<2x16x128xf32, #tpu.memory_space<vmem>>) attributes {dimension_semantics = [#tpu.dimension_semantics<parallel>], iteration_bounds = array<i64: 2>, scalar_prefetch = 0 : i64, scratch_operands = 0 : i64, tpu.core_type = #tpu.core_type<tc>, window_params = [{transform_indices = @transform_0, window_bounds = array<i64: 2, 16, 128>}, {pipeline_mode = #tpu.pipeline_mode<synchronous>, transform_indices = @transform_1, window_bounds = array<i64: 2, 8>}, {transform_indices = @transform_2, window_bounds = array<i64: 16, 8>}, {transform_indices = @transform_3, window_bounds = array<i64: 16, 1>}, {transform_indices = @transform_4, window_bounds = array<i64: 16, 8>}, {transform_indices = @transform_5, window_bounds = array<i64: 16, 1>}, {transform_indices = @transform_6, window_bounds = array<i64: 2, 16, 128>}]} {
    %c0 = arith.constant 0 : index
    %c0_0 = arith.constant 0 : index
    %0 = vector.load %arg2[%c0, %c0_0] : memref<2x8xf32, #tpu.memory_space<vmem>>, vector<2x8xf32>
    %c0_1 = arith.constant 0 : index
    %c0_2 = arith.constant 0 : index
    %1 = vector.load %arg3[%c0_1, %c0_2] : memref<16x8xf32, #tpu.memory_space<vmem>>, vector<16x8xf32>
    %c0_3 = arith.constant 0 : index
    %c0_4 = arith.constant 0 : index
    %2 = vector.load %arg5[%c0_3, %c0_4] : memref<16x8xf32, #tpu.memory_space<vmem>>, vector<16x8xf32>
    "tpu.trace_start"() <{level = 10 : i32, message = "bc,fc->bf"}> : () -> ()
    %cst = arith.constant dense<0.000000e+00> : vector<2x16xf32>
    %3 = tpu.matmul %0, %1, %cst {dimension_numbers = #tpu.dot_dimension_numbers<[1], [1], [0], [0], [0, 0, 1, 0], [], []>} : vector<2x8xf32>, vector<16x8xf32>, vector<2x16xf32> -> vector<2x16xf32>
    %cst_5 = arith.constant dense<0.000000e+00> : vector<2x16xf32>
    %4 = tpu.matmul %0, %2, %cst_5 {dimension_numbers = #tpu.dot_dimension_numbers<[1], [1], [0], [0], [0, 0, 1, 0], [], []>} : vector<2x8xf32>, vector<16x8xf32>, vector<2x16xf32> -> vector<2x16xf32>
    "tpu.trace_stop"() : () -> ()
    %5 = vector.shape_cast %3 : vector<2x16xf32> to vector<2x16x1xf32>
    %c0_6 = arith.constant 0 : index
    %c0_7 = arith.constant 0 : index
    %6 = vector.load %arg4[%c0_6, %c0_7] : memref<16x1xf32, #tpu.memory_space<vmem>>, vector<16x1xf32>
    %7 = vector.shape_cast %6 : vector<16x1xf32> to vector<1x16x1xf32>
    %8 = vector.broadcast %7 : vector<1x16x1xf32> to vector<2x16x1xf32>
    %9 = arith.addf %5, %8 : vector<2x16x1xf32>
    %10 = vector.shape_cast %4 : vector<2x16xf32> to vector<2x16x1xf32>
    %c0_8 = arith.constant 0 : index
    %c0_9 = arith.constant 0 : index
    %11 = vector.load %arg6[%c0_8, %c0_9] : memref<16x1xf32, #tpu.memory_space<vmem>>, vector<16x1xf32>
    %12 = vector.shape_cast %11 : vector<16x1xf32> to vector<1x16x1xf32>
    %13 = vector.broadcast %12 : vector<1x16x1xf32> to vector<2x16x1xf32>
    %14 = arith.addf %10, %13 : vector<2x16x1xf32>
    %c0_10 = arith.constant 0 : index
    %c0_11 = arith.constant 0 : index
    %c0_12 = arith.constant 0 : index
    %15 = vector.load %arg1[%c0_10, %c0_11, %c0_12] : memref<2x16x128xf32, #tpu.memory_space<vmem>>, vector<2x16x128xf32>
    %cst_13 = arith.constant dense<0.000000e+00> : vector<16xf32>
    %16 = vector.multi_reduction <add>, %15, %cst_13 [0, 2] : vector<2x16x128xf32> to vector<16xf32>
    %17 = vector.shape_cast %16 : vector<16xf32> to vector<1x16x1xf32>
    %cst_14 = arith.constant 2.560000e+02 : f32
    %18 = vector.broadcast %cst_14 : f32 to vector<1x16x1xf32>
    %19 = arith.divf %17, %18 : vector<1x16x1xf32>
    %20 = vector.broadcast %19 : vector<1x16x1xf32> to vector<2x16x128xf32>
    %21 = arith.subf %15, %20 : vector<2x16x128xf32>
    %22 = arith.mulf %21, %21 : vector<2x16x128xf32>
    %cst_15 = arith.constant dense<0.000000e+00> : vector<16xf32>
    %23 = vector.multi_reduction <add>, %22, %cst_15 [0, 2] : vector<2x16x128xf32> to vector<16xf32>
    %24 = vector.shape_cast %23 : vector<16xf32> to vector<1x16x1xf32>
    %cst_16 = arith.constant 2.560000e+02 : f32
    %25 = vector.broadcast %cst_16 : f32 to vector<1x16x1xf32>
    %26 = arith.divf %24, %25 : vector<1x16x1xf32>
    %cst_17 = arith.constant 9.99999974E-6 : f32
    %27 = vector.broadcast %cst_17 : f32 to vector<1x16x1xf32>
    %28 = arith.addf %26, %27 : vector<1x16x1xf32>
    %29 = math.rsqrt %28 : vector<1x16x1xf32>
    %30 = vector.broadcast %29 : vector<1x16x1xf32> to vector<2x16x1xf32>
    %31 = arith.mulf %9, %30 : vector<2x16x1xf32>
    %32 = vector.broadcast %19 : vector<1x16x1xf32> to vector<2x16x1xf32>
    %33 = arith.mulf %31, %32 : vector<2x16x1xf32>
    %34 = arith.subf %14, %33 : vector<2x16x1xf32>
    %35 = vector.broadcast %31 : vector<2x16x1xf32> to vector<2x16x128xf32>
    %36 = arith.mulf %15, %35 : vector<2x16x128xf32>
    %37 = vector.broadcast %34 : vector<2x16x1xf32> to vector<2x16x128xf32>
    %38 = arith.addf %36, %37 : vector<2x16x128xf32>
    %c0_18 = arith.constant 0 : index
    %c0_19 = arith.constant 0 : index
    %c0_20 = arith.constant 0 : index
    %39 = vector.load %arg7[%c0_18, %c0_19, %c0_20] : memref<2x16x128xf32, #tpu.memory_space<vmem>>, vector<2x16x128xf32>
    tpu.vector_store %arg7[%c0_18, %c0_19, %c0_20], %38 {strides = array<i32>} : memref<2x16x128xf32, #tpu.memory_space<vmem>>, vector<2x16x128xf32>,
    return
  }
  func.func @transform_0(%arg0: i32) -> (i32, i32, i32) {
    %c0_i32 = arith.constant 0 : i32
    %c0_i32_0 = arith.constant 0 : i32
    %c0_i32_1 = arith.constant 0 : i32
    return %c0_i32, %arg0, %c0_i32_0 : i32, i32, i32
  }
  func.func @transform_1(%arg0: i32) -> (i32, i32) {
    %c0_i32 = arith.constant 0 : i32
    %c0_i32_0 = arith.constant 0 : i32
    %c0_i32_1 = arith.constant 0 : i32
    return %c0_i32, %c0_i32_0 : i32, i32
  }
  func.func @transform_2(%arg0: i32) -> (i32, i32) {
    %c0_i32 = arith.constant 0 : i32
    %c0_i32_0 = arith.constant 0 : i32
    return %arg0, %c0_i32 : i32, i32
  }
  func.func @transform_3(%arg0: i32) -> (i32, i32) {
    %c0_i32 = arith.constant 0 : i32
    %c0_i32_0 = arith.constant 0 : i32
    return %arg0, %c0_i32 : i32, i32
  }
  func.func @transform_4(%arg0: i32) -> (i32, i32) {
    %c0_i32 = arith.constant 0 : i32
    %c0_i32_0 = arith.constant 0 : i32
    return %arg0, %c0_i32 : i32, i32
  }
  func.func @transform_5(%arg0: i32) -> (i32, i32) {
    %c0_i32 = arith.constant 0 : i32
    %c0_i32_0 = arith.constant 0 : i32
    return %arg0, %c0_i32 : i32, i32
  }
  func.func @transform_6(%arg0: i32) -> (i32, i32, i32) {
    %c0_i32 = arith.constant 0 : i32
    %c0_i32_0 = arith.constant 0 : i32
    %c0_i32_1 = arith.constant 0 : i32
    return %c0_i32, %arg0, %c0_i32_0 : i32, i32, i32
  }
}

</mosaic_0001>

<bundles_post_ra>
// kernel: tpu_custom_call.1
= control target key start
LH: loop header
LB: loop body
LE: loop exit
PB: predicated region body
PF: predicated region fallthrough
CT: control target
= control target key end

     0   :  { %11 = vsyncpa [#allocation4], 0  ;;  %s1222_s0 = inlined_call_operand.vmem [shape: f32[2,32,128], index: 0, kind: input, shape index: {}]   ;;  %s1223_s1 = inlined_call_operand.vmem [shape: f32[2,8], index: 1, kind: input, shape index: {}]   ;;  %s1224_s2 = inlined_call_operand.vmem [shape: f32[32,8], index: 2, kind: input, shape index: {}]   ;;  %s1225_s3 = inlined_call_operand.vmem [shape: f32[32,1], index: 3, kind: input, shape index: {}]   ;;  %s1226_s4 = inlined_call_operand.vmem [shape: f32[32,8], index: 4, kind: input, shape index: {}]   ;;  %s1227_s5 = inlined_call_operand.vmem [shape: f32[32,1], index: 5, kind: input, shape index: {}]   ;;  %s1228_s6 = inlined_call_operand.hbm [shape: f32[2,32,128], index: 6, kind: output, shape index: {}]  }
   0x1   :  { %13 = vsyncpa [#allocation4 + $0x1], 0  ;;  %s1062_s21 = smov 0   ;;  %s1064_s22 = smov 0  }
   0x2   :  { %s1066_s23 = smov 0   ;;  %s1068_s24 = smov 0  }
   0x3 LB: > { %s1083_s25 = sadd.s32 4294967295, %s1014_s24   ;;  %s860_s26 = sadd.s32 4294967294, %s1014_s24   ;;  %s1014_s24 = sphi %s1068_s24, %s1234_s24   ;;  %s1010_s23 = sphi %s1066_s23, %s1233_s23   ;;  %s1006_s22 = sphi %s1064_s22, %s1232_s22   ;;  %s1002_s21 = sphi %s1062_s21, %s1231_s21  }
   0x4   : > { %s1087_s27 = sadd.s32 1, %s1014_s24   ;;  %s26_s28 = sadd.s32 1, %s1010_s23 }
   0x5   : > { %s23_s29 = ssub.s32 %s1014_s24, %s1087_s27  ;;  %p33_p0 = scmp.ne.s32.totalorder %s1010_s23, %s1006_s22 }
   0x6   : > { %p24_p1 = scmp.eq.s32.totalorder %s23_s29, 0  ;;  %p34_p2 = scmp.eq.s32.totalorder %s1014_s24, 0 }
   0x7   : > { %p188_p3 = scmp.eq.s32.totalorder %s1083_s25, 1  ;;  %p193_p4 = scmp.ne.s32.totalorder %s1006_s22, %s1002_s21 }
   0x8   : > { %s1099_s30 = scalar_select %p24_p1, %s1010_s23, %s26_s28  }
   0x9   : > { %p35_p5 = por %p34_p2, %p33_p0  ;;  %p1101_p6 = por %p188_p3, %p33_p0 }
   0xa   : > { %p194_p7 = scmp.eq.s32.totalorder %s860_s26, 1  ;;  %p862_p9 = scmp.ge.s32.totalorder %s1014_s24, 2 }
   0xc   : > { %p1105_p8 = por %p194_p7, %p193_p4  ;;  %213 = sbr.rel (%p862_p9) target bundleno = 26 (0x1a), region = 20 }
  0x13   : > { %216 = sbr.rel (!%p35_p5) target bundleno = 26 (0x1a), region = 24  ;;  %s218_s9 = sand.u32 (%p35_p5), 1, %s1010_s23  }
  0x14   : > { %s888_s10 = sshll.u32 (%p35_p5), %s1014_s24, 4  ;;  %s863_s11 = sshll.u32 (%p35_p5), %s218_s9, 5 }
  0x15   : > { %s223_s14 = scalar_lea.vmem (%p35_p5), %s1222_s0, %s888_s10  ;;  %s220_s15 = scalar_lea.vmem (%p35_p5), [#allocation2], %s863_s11 }
  0x16   : > { %v257_v0 = vld [vmem:[%s223_s14] sm:$0xff] (%p35_p5)  ;;  %v259_v1 = vld [vmem:[%s223_s14 + $0x8] sm:$0xff] (%p35_p5) }
  0x17   : > { %v261_v2 = vld [vmem:[%s223_s14 + $0x20] sm:$0xff] (%p35_p5)  ;;  %258 = vst [vmem:[%s220_s15] sm:$0xff] (%p35_p5), %v257_v0  ;;  %260 = vst [vmem:[%s220_s15 + $0x8] sm:$0xff] (%p35_p5), %v259_v1  ;;  %v263_v3 = vld [vmem:[%s223_s14 + $0x28] sm:$0xff] (%p35_p5) }
  0x18   : > { %262 = vst [vmem:[%s220_s15 + $0x10] sm:$0xff] (%p35_p5), %v261_v2  ;;  %264 = vst [vmem:[%s220_s15 + $0x18] sm:$0xff] (%p35_p5), %v263_v3 }
  0x1a PF: > { %p866_p10 = scmp.ge.s32.totalorder %s1014_s24, 1  ;;  %p305_p11 = scmp.lt.s32.totalorder %s1014_s24, 3 }
  0x1c   : > { %p306_p12 = pnand %p866_p10, %p305_p11 }
  0x1d   : > { %s869_s16 = sshll.u32 (!%p306_p12), %s1083_s25, 1  ;;  %s312_s17 = sand.u32 (!%p306_p12), 1, %s1006_s22   ;;  %v1016_v4 = vmov (!%p306_p12), 0.0|0.0   ;;  %vm1017_vm0 = vmmov (!%p306_p12), 0   ;;  %v1018_v5 = vmov (!%p306_p12), 0.0   ;;  %vm392_vm1 = vcmask (!%p306_p12), 64512  }
  0x1e   : > { %309 = sbr.rel (%p306_p12) target bundleno = 539 (0x21b), region = 78  ;;  %910 = vmatprep.subr.bf16.mxu0 (!%p306_p12), %v1016_v4  ;;  %p363_p13 = scmp.lt.s32.totalorder (!%p306_p12), %s869_s16, 3  ;;  %914 = vmatprep.subr.bf16.mxu1 (!%p306_p12), %v1016_v4  ;;  %vm912_vm2 = vmpackc.low (!%p306_p12), %vm392_vm1, %vm392_vm1  ;;  %v387_v18 = vld [vmem:[%s1223_s1] sm:$0x3] (!%p306_p12)  ;;  %v548_v33 = vlaneseq (!%p306_p12)  ;;  %v1019_v35 = vmov (!%p306_p12), 0  }
  0x1f   : > { %s1123_s18 = sshll.u32 (!%p306_p12), %s312_s17, 5  ;;  %900 = vmatprep.mubr.msk.f32.mxu0 (!%p306_p12), %vm1017_vm0, %v1018_v5  ;;  %907 = vmatprep.mubr.msk.f32.mxu1 (!%p306_p12), %vm1017_vm0, %v1018_v5 }
  0x20   : > { %s314_s19 = scalar_lea.vmem (!%p306_p12), [#allocation2], %s1123_s18  ;;  %v549_v34 = vshrl.u32 (!%p306_p12), %v548_v33, 7  ;;  %975 = vset.pattern.permute.xlu1 (!%p306_p12), %v1019_v35  ;;  %974 = vset.pattern.permute.xlu0 (!%p306_p12), %v1019_v35 }
  0x21   : > { %v1126_v6 = vld [vmem:[%s314_s19] sm:$0xff] (!%p306_p12)  ;;  %v1128_v7 = vld [vmem:[%s314_s19 + $0x10] sm:$0xff] (!%p306_p12)  ;;  %v1130_v8 = vld [vmem:[%s314_s19 + $0x8] sm:$0xff] (!%p306_p12) }
  0x22   : > { %v608_v9 = vadd.f32 (!%p306_p12), %v1128_v7, %v1126_v6  ;;  %v1134_v10 = vld [vmem:[%s314_s19 + $0x18] sm:$0xff] (!%p306_p12)  ;;  %v550_v36 = vsub.s32 (!%p306_p12), 0, %v549_v34  ;;  %v561_v41 = vsub.s32 (!%p306_p12), 1, %v549_v34 }
  0x23   : > { %v611_v11 = vadd.f32 (!%p306_p12), %v1134_v10, %v1130_v8 }
  0x24   : > { %609 = vadd.xlane.f32.xlu0 (!%p306_p12), %v608_v9 }
  0x25   : > { %s1236_s16 = smov (!%p363_p13, %s869_s16), 3 }
  0x26   : > { %s1136_s20 = sshll.u32 %s1236_s16, 3 }
  0x27   : > { %s366_s29 = scalar_lea.vmem %s1224_s2, %s1136_s20  ;;  %s378_s11 = scalar_lea.vmem %s1226_s4, %s1136_s20 }
  0x28   : > { %v388_v12 = vld [vmem:[%s366_s29] sm:$0xff]  ;;  %v389_v13 = vld [vmem:[%s366_s29 + $0x8] sm:$0xff]  ;;  %612 = vadd.xlane.f32.xlu0 %v611_v11  ;;  %s372_s16 = scalar_lea.vmem %s1225_s3, %s1136_s20  ;;  %s384_s28 = scalar_lea.vmem %s1227_s5, %s1136_s20 }
  0x29   : > { %v390_v14 = vld [vmem:[%s378_s11] sm:$0xff]  ;;  %v911_v15 = vpack.c.bf16 %v389_v13, %v388_v12  ;;  %v391_v16 = vld [vmem:[%s378_s11 + $0x8] sm:$0xff]  ;;  %s360_s20 = scalar_lea.vmem [#allocation3], %s1123_s18  ;;  %s702_s29 = scalar_lea.sflag [#allocation4], %s312_s17 }
  0x2a   : > { %v915_v17 = vpack.c.bf16 %v391_v16, %v390_v14  ;;  %v571_v52 = vld [vmem:[%s372_s16 + $0x8] sm:$0xff]  ;;  %v570_v53 = vld [vmem:[%s372_s16] sm:$0xff] }
  0x2b   : > { %913 = vmatpush3.bf16.xpose.msk.msra.mxu0 %vm912_vm2, %v911_v15  ;;  %v598_v63 = vld [vmem:[%s384_s28] sm:$0xff]  ;;  %v599_v12 = vld [vmem:[%s384_s28 + $0x8] sm:$0xff] }
  0x2c   : > { %917 = vmatpush3.bf16.xpose.msk.msra.mxu1 %vm912_vm2, %v915_v17 }
  0x32   : > { %901 = vmatmul.mubr.msk.f32.vlgmr.msra.gmra.mrb[0].mxu0 %vm392_vm1, %v387_v18 }
  0x33   : > { %908 = vmatmul.mubr.msk.f32.vlgmr.msra.gmra.mrb[0].mxu1 %vm392_vm1, %v387_v18 }
  0xb1   : > { %v610_v19 = vpop.xlane.xlu0 %609 }
  0xb2   : > { %v1155_v20 = vmul.f32 0.00390625, %v610_v19 }
  0xb4   : > { %v617_v21 = vsub.f32 %v1126_v6, %v1155_v20  ;;  %v619_v22 = vsub.f32 %v1128_v7, %v1155_v20 }
  0xb5   : > { %v613_v23 = vpop.xlane.xlu0 %612 }
  0xb6   : > { %v1161_v24 = vmul.f32 0.00390625, %v613_v23  ;;  %v621_v25 = vmul.f32 %v617_v21, %v617_v21  ;;  %v623_v26 = vmul.f32 %v619_v22, %v619_v22 }
  0xb8   : > { %v625_v27 = vadd.f32 %v623_v26, %v621_v25  ;;  %v618_v28 = vsub.f32 %v1130_v8, %v1161_v24  ;;  %v620_v29 = vsub.f32 %v1134_v10, %v1161_v24 }
  0xba   : > { %626 = vadd.xlane.f32.xlu1 %v625_v27  ;;  %v622_v30 = vmul.f32 %v618_v28, %v618_v28  ;;  %v624_v31 = vmul.f32 %v620_v29, %v620_v29 }
  0xbc   : > { %v628_v32 = vadd.f32 %v624_v31, %v622_v30 }
  0xbe   : > { %629 = vadd.xlane.f32.xlu1 %v628_v32 }
 0x105   : > { %v468_v37 = vpop.f32.mrb[0].mxu0 }
 0x106   : > { %v902_v38 = vpop.f32.mrb[1].mxu0  ;;  %v551_v39 = vrot.slane %v468_v37, %v550_v36  ;;  %v544_v40 = vpop.f32.mrb[0].mxu1  ;;  %v562_v44 = vrot.slane %v468_v37, %v561_v41 }
 0x107   : > { %v909_v42 = vpop.f32.mrb[1].mxu1  ;;  %v579_v43 = vrot.slane %v544_v40, %v550_v36  ;;  %v590_v45 = vrot.slane %v544_v40, %v561_v41 }
 0x108   : > { %553 = vbcast.lane.b32.xlu0 %v551_v39, 256  ;;  %557 = vbcast.lane.b32.xlu1 %v551_v39, 264 }
 0x10c   : > { %581 = vbcast.lane.b32.xlu0 %v579_v43, 256  ;;  %564 = vbcast.lane.b32.xlu1 %v562_v44, 256 }
 0x110   : > { %592 = vbcast.lane.b32.xlu0 %v590_v45, 256  ;;  %568 = vbcast.lane.b32.xlu1 %v562_v44, 264 }
 0x114   : > { %585 = vbcast.lane.b32.xlu1 %v579_v43, 264 }
 0x118   : > { %596 = vbcast.lane.b32.xlu1 %v590_v45, 264 }
 0x147   : > { %v627_v46 = vpop.xlane.xlu1 %626 }
 0x148   : > { %v631_v48 = vmul.f32 0.00390625, %v627_v46 }
 0x14a   : > { %v633_v50 = vadd.f32 1e-05, %v631_v48 }
 0x14b   : > { %v630_v47 = vpop.xlane.xlu1 %629 }
 0x14c   : > { %v632_v49 = vmul.f32 0.00390625, %v630_v47  ;;  %976 = vrsqrt.f32 %v633_v50 }
 0x14e   : > { %v634_v51 = vadd.f32 1e-05, %v632_v49 }
 0x150   : > { %978 = vrsqrt.f32 %v634_v51 }
 0x156   : > { %v977_v54 = vpop.eup %976 }
 0x15a   : > { %v979_v55 = vpop.eup %978 }
 0x17a   : > { %v558_v56 = vpop.permute.xlu1 %557  ;;  %v554_v57 = vpop.permute.xlu0 %553 }
 0x17b   : > { %v573_v58 = vadd.f32 %v571_v52, %v558_v56  ;;  %v572_v59 = vadd.f32 %v570_v53, %v554_v57 }
 0x17d   : > { %v638_v60 = vmul.f32 %v979_v55, %v573_v58  ;;  %v637_v61 = vmul.f32 %v977_v54, %v572_v59 }
 0x17e   : > { %v565_v62 = vpop.permute.xlu1 %564  ;;  %v582_v0 = vpop.permute.xlu0 %581 }
 0x17f   : > { %v574_v1 = vadd.f32 %v570_v53, %v565_v62  ;;  %656 = vperm.xlu1 %975, %v638_v60   ;;  %651 = vperm.xlu0 %974, %v637_v61   ;;  %v641_v3 = vmul.f32 %v637_v61, %v1155_v20  ;;  %v600_v4 = vadd.f32 %v598_v63, %v582_v0 }
 0x180   : > { %v642_v18 = vmul.f32 %v638_v60, %v1161_v24 }
 0x181   : > { %v639_v2 = vmul.f32 %v977_v54, %v574_v1  ;;  %v645_v13 = vsub.f32 %v600_v4, %v641_v3 }
 0x182   : > { %v569_v5 = vpop.permute.xlu1 %568  ;;  %v593_v9 = vpop.permute.xlu0 %592 }
 0x183   : > { %v575_v11 = vadd.f32 %v571_v52, %v569_v5  ;;  %661 = vperm.xlu1 %975, %v639_v2   ;;  %v643_v15 = vmul.f32 %v639_v2, %v1155_v20  ;;  %v602_v16 = vadd.f32 %v598_v63, %v593_v9 }
 0x185   : > { %v640_v14 = vmul.f32 %v979_v55, %v575_v11  ;;  %v647_v21 = vsub.f32 %v602_v16, %v643_v15 }
 0x186   : > { %v586_v17 = vpop.permute.xlu1 %585 }
 0x187   : > { %v601_v19 = vadd.f32 %v599_v12, %v586_v17  ;;  %666 = vperm.xlu0 %974, %v640_v14   ;;  %675 = vperm.xlu1 %975, %v645_v13   ;;  %v644_v25 = vmul.f32 %v640_v14, %v1161_v24 }
 0x189   : > { %v646_v22 = vsub.f32 %v601_v19, %v642_v18 }
 0x18a   : > { %v597_v23 = vpop.permute.xlu1 %596 }
 0x18b   : > { %v603_v26 = vadd.f32 %v599_v12, %v597_v23  ;;  %680 = vperm.xlu0 %974, %v646_v22   ;;  %685 = vperm.xlu1 %975, %v647_v21  }
 0x18d   : > { %v648_v27 = vsub.f32 %v603_v26, %v644_v25 }
 0x18f   : > { %690 = vperm.xlu0 %974, %v648_v27  }
 0x1fe   : > { %v657_v28 = vpop.permute.xlu1 %656  ;;  %v652_v20 = vpop.permute.xlu0 %651 }
 0x1ff   : > { %v669_v30 = vmul.f32 %v652_v20, %v1126_v6  ;;  %v670_v34 = vmul.f32 %v657_v28, %v1130_v8 }
 0x202   : > { %v662_v29 = vpop.permute.xlu1 %661 }
 0x203   : > { %v671_v35 = vmul.f32 %v662_v29, %v1128_v7 }
 0x206   : > { %v676_v31 = vpop.permute.xlu1 %675  ;;  %v667_v32 = vpop.permute.xlu0 %666 }
 0x207   : > { %v693_v33 = vadd.f32 %v676_v31, %v669_v30  ;;  %v672_v39 = vmul.f32 %v667_v32, %v1134_v10 }
 0x209   : > { %697 = vst [vmem:[%s360_s20] sm:$0xff] %v693_v33 }
 0x20a   : > { %v686_v24 = vpop.permute.xlu1 %685  ;;  %v681_v36 = vpop.permute.xlu0 %680 }
 0x20b   : > { %v695_v37 = vadd.f32 %v686_v24, %v671_v35  ;;  %v694_v38 = vadd.f32 %v681_v36, %v670_v34 }
 0x20d   : > { %699 = vst [vmem:[%s360_s20 + $0x10] sm:$0xff] %v695_v37  ;;  %698 = vst [vmem:[%s360_s20 + $0x8] sm:$0xff] %v694_v38 }
 0x20e   : > { %v691_v40 = vpop.permute.xlu0 %690 }
 0x20f   : > { %v696_v6 = vadd.f32 %v691_v40, %v672_v39 }
 0x211   : > { %700 = vst [vmem:[%s360_s20 + $0x18] sm:$0xff] %v696_v6 }
 0x212   : > { %s889_s18 = sshll.u32 %s1083_s25, 8  ;;  %s731_s9 = sshll.u32 %s360_s20, 4  ;;  %s732_s9 = int_to_ptr.vmem [resolvable:$true] %s731_s9 }
 0x213   : > { %s714_s12 = scalar_lea.hbm %s1228_s6, %s889_s18  ;;  %s1020_s13 = smov 256  }
 0x214   : > { %918 = sst [smem:[#allocation6]] (%p1101_p6), %s1020_s13  ;;  %s1021_s14 = smov 512  }
 0x215   : > { %919 = sst [smem:[#allocation6 + $0x1]] (%p1101_p6), %s1021_s14  ;;  %s1022_s17 = smov 2  }
 0x216   : > { %920 = sst [smem:[#allocation6 + $0x2]] (%p1101_p6), %s1022_s17  ;;  %s1023_s15 = smov 128  }
 0x217   : > { %921 = sst [smem:[#allocation6 + $0x3]] (%p1101_p6), %s1023_s15  ;;  %s1024_s25 = smov 8  }
 0x218   : > { %922 = sst [smem:[#allocation6 + $0x4]] (%p1101_p6), %s1023_s15  ;;  %s1025_s16 = smov [#allocation5]  }
 0x219   : > { %923 = sst [smem:[#allocation6 + $0x5]] (%p1101_p6), %s1024_s25  ;;  %s1026_s19 = smov 0  }
 0x21a   : > { %924 = dma.general (%p1101_p6), %s732_s9, 512, %s714_s12, %s702_s29, %s1025_s16, [#allocation6], %s1026_s19, 0  }
 0x21b PF: > { %s759_s26 = sand.u32 1, %s1002_s21   ;;  %p927_p0 = pnand %p862_p9, %p1105_p8 }
 0x21c   : > { %s760_s28 = scalar_lea.sflag [#allocation4], %s759_s26 }
 0x21d   : > { %997 = dma.done.wait (!%p927_p0), %s760_s28, 512  }
 0x21e   : > { %999 = vsyncadd (!%p927_p0), %s760_s28, 4294966784  ;;  %p16_p1 = scmp.ge.s32.totalorder %s1087_s27, 4   ;;  %s1231_s21 = smov %s1006_s22 }
 0x21f   : > { %s1232_s22 = smov %s1010_s23  ;;  %s1233_s23 = smov %s1099_s30 }
 0x220   : > { %s1234_s24 = smov %s1087_s27  ;;  %18 = sbr.rel (!%p16_p1) target bundleno = 3 (0x3), region = 139 }
 0x227   :  { %765 = vsyncpa [#allocation4], 1 }
 0x228   :  { %767 = vsyncpa [#allocation4 + $0x1], 1 }

</bundles_post_ra>
